<compile_context>
chip_gen: v5e
topology: v5e:2x2
jax: 0.10.0
libtpu: 0.0.40
codegen_flags: <defaults>
</compile_context>

<pallas_src>
import functools

import jax
import jax.numpy as jnp
from jax import lax
from jax.experimental import pallas as pl
from jax.experimental.pallas import tpu as pltpu


# ----------------------------------------------------------------------------
# helpers
# ----------------------------------------------------------------------------
def _pick_tile(dim, target):
    """Largest exact tile <= target that divides dim (full dim if it is small)."""
    if dim <= target:
        return dim
    if dim % target == 0:
        return target
    for t in range(target, 0, -1):
        if dim % t == 0:
            return t
    return dim


# ----------------------------------------------------------------------------
# Kernel 1: tiled dense layer  y = x @ W^T + b   (in-proj and out-proj)
# ----------------------------------------------------------------------------
def _linear_kernel(x_ref, w_ref, b_ref, o_ref, acc_ref):
    # x tile: (tm, tk), w tile: (tn, tk)  (PyTorch Linear weight layout), b: (1, tn)
    k = pl.program_id(2)

    @pl.when(k == 0)
    def _():
        acc_ref[...] = jnp.zeros_like(acc_ref)

    # Contract on the last dim of both operands (no .T / XLU transpose).
    acc_ref[...] += lax.dot_general(
        x_ref[...], w_ref[...],
        dimension_numbers=(((1,), (1,)), ((), ())),
        preferred_element_type=jnp.float32,
    )

    @pl.when(k == pl.num_programs(2) - 1)
    def _():
        o_ref[...] = (acc_ref[...] + b_ref[...]).astype(o_ref.dtype)


def linear(x, w, b, *, tm=128, tn=128, tk=256):
    M, K = x.shape
    N, K2 = w.shape
    assert K == K2
    tm = _pick_tile(M, tm)
    tn = _pick_tile(N, tn)
    tk = _pick_tile(K, tk)
    b2d = b.reshape(1, N)
    grid = (M // tm, N // tn, K // tk)
    return pl.pallas_call(
        _linear_kernel,
        out_shape=jax.ShapeDtypeStruct((M, N), x.dtype),
        grid=grid,
        in_specs=[
            pl.BlockSpec((tm, tk), lambda i, j, k: (i, k)),
            pl.BlockSpec((tn, tk), lambda i, j, k: (j, k)),
            pl.BlockSpec((1, tn), lambda i, j, k: (0, j)),
        ],
        out_specs=pl.BlockSpec((tm, tn), lambda i, j, k: (i, j)),
        scratch_shapes=[pltpu.VMEM((tm, tn), jnp.float32)],
        compiler_params=pltpu.CompilerParams(
            dimension_semantics=("parallel", "parallel", "arbitrary")
        ),
    )(x, w, b2d)


# ----------------------------------------------------------------------------
# Kernel 2: per-batch multi-head scaled-dot-product attention
#   - all heads of one batch element per grid step
#   - head-averaged attention weights accumulated in-kernel
# ----------------------------------------------------------------------------
def _attn_kernel(*refs, scaling, num_heads, has_mask):
    if has_mask:
        q_ref, k_ref, v_ref, mask_ref, o_ref, w_ref = refs
    else:
        q_ref, k_ref, v_ref, o_ref, w_ref = refs
        mask_ref = None

    T = q_ref.shape[0]
    S = k_ref.shape[0]
    inv_h = 1.0 / num_heads

    w_acc = jnp.zeros((T, S), jnp.float32)
    for h in range(num_heads):                       # static, small unrolled loop
        qh = q_ref[:, 0, h, :].astype(jnp.float32) * scaling   # (T, Hd)
        kh = k_ref[:, 0, h, :].astype(jnp.float32)             # (S, Hd)
        vh = v_ref[:, 0, h, :].astype(jnp.float32)             # (S, Hd)

        # scores: contract on head_dim without transposing K (MXU-native).
        s = lax.dot_general(
            qh, kh, dimension_numbers=(((1,), (1,)), ((), ())),
            preferred_element_type=jnp.float32,
        )                                                      # (T, S)
        if has_mask:
            s = s + mask_ref[...]

        # softmax over keys (f32, like F.softmax(...float()))
        s = s - jnp.max(s, axis=-1, keepdims=True)
        p = jnp.exp(s)
        p = p * pl.reciprocal(jnp.sum(p, axis=-1, keepdims=True), approx=True)

        o = lax.dot_general(
            p, vh, dimension_numbers=(((1,), (0,)), ((), ())),
            preferred_element_type=jnp.float32,
        )                                                      # (T, Hd)
        o_ref[:, 0, h, :] = o.astype(o_ref.dtype)
        w_acc = w_acc + p

    w_ref[0] = w_acc * inv_h                                   # head-averaged weights


def attention(q, k, v, mask, scaling):
    # q: (T, B, H, Hd), k/v: (S, B, H, Hd), mask: (T, S) or None
    T, B, H, Hd = q.shape
    S = k.shape[0]
    has_mask = mask is not None

    kern = functools.partial(
        _attn_kernel, scaling=scaling, num_heads=H, has_mask=has_mask
    )

    in_specs = [
        pl.BlockSpec((T, 1, H, Hd), lambda b: (0, b, 0, 0)),
        pl.BlockSpec((S, 1, H, Hd), lambda b: (0, b, 0, 0)),
        pl.BlockSpec((S, 1, H, Hd), lambda b: (0, b, 0, 0)),
    ]
    operands = [q, k, v]
    if has_mask:
        in_specs.append(pl.BlockSpec((T, S), lambda b: (0, 0)))
        operands.append(mask.astype(jnp.float32))

    return pl.pallas_call(
        kern,
        out_shape=(
            jax.ShapeDtypeStruct((T, B, H, Hd), q.dtype),
            jax.ShapeDtypeStruct((B, T, S), jnp.float32),
        ),
        grid=(B,),
        in_specs=in_specs,
        out_specs=(
            pl.BlockSpec((T, 1, H, Hd), lambda b: (0, b, 0, 0)),
            pl.BlockSpec((1, T, S), lambda b: (b, 0, 0)),
        ),
        compiler_params=pltpu.CompilerParams(
            dimension_semantics=("parallel",)
        ),
    )(*operands)


# ----------------------------------------------------------------------------
# MultiheadAttention forward (glue in plain JAX, hot paths in Pallas)
# ----------------------------------------------------------------------------
def multihead_attention_forward(params, query, key, value, attn_mask=None):
    num_heads = params["num_heads"]
    embed_dim = params["embed_dim"]
    head_dim = embed_dim // num_heads
    scaling = head_dim ** (-0.5)

    T, B, E = query.shape
    assert E == embed_dim
    S = key.shape[0]

    w_in = params["in_proj_weight"]
    b_in = params["in_proj_bias"]

    if (query is key) and (key is value):
        # self-attention fast path: fused qkv in-projection
        qkv = linear(query.reshape(T * B, E), w_in, b_in)            # (T*B, 3E)
        qkv = qkv.reshape(T, B, 3, num_heads, head_dim)              # free reshape
        q = qkv[:, :, 0]                                             # (T, B, H, Hd)
        k = qkv[:, :, 1]
        v = qkv[:, :, 2]
    else:
        q = linear(query.reshape(T * B, E), w_in[:E], b_in[:E])
        k = linear(key.reshape(S * B, E), w_in[E:2 * E], b_in[E:2 * E])
        v = linear(value.reshape(S * B, E), w_in[2 * E:], b_in[2 * E:])
        q = q.reshape(T, B, num_heads, head_dim)
        k = k.reshape(S, B, num_heads, head_dim)
        v = v.reshape(S, B, num_heads, head_dim)

    # attention (no wrapper transposes: BlockSpec indexes the batch axis)
    attn_h, attn_w = attention(q, k, v, attn_mask, scaling)
    # attn_h: (T, B, H, Hd) -> (T, B, E) is a free reshape (contiguous merge)
    attn = attn_h.reshape(T, B, E)

    # out projection
    out = linear(attn.reshape(T * B, E), params["out_proj_weight"],
                 params["out_proj_bias"]).reshape(T, B, E)

    # attn_w already head-averaged in-kernel: (B, T, S)
    return out, attn_w


# ----------------------------------------------------------------------------
# Deterministic parameter init (xavier_uniform, zero biases)
# ----------------------------------------------------------------------------
def init_params(key, embed_dim, num_heads):
    k1, k2 = jax.random.split(key)

    def xavier_uniform(k, shape):
        fan_out, fan_in = shape
        bound = (6.0 / (fan_in + fan_out)) ** 0.5
        return jax.random.uniform(k, shape, jnp.float32, -bound, bound)

    return {
        "embed_dim": embed_dim,
        "num_heads": num_heads,
        "in_proj_weight": xavier_uniform(k1, (3 * embed_dim, embed_dim)),
        "in_proj_bias": jnp.zeros((3 * embed_dim,), jnp.float32),
        "out_proj_weight": xavier_uniform(k2, (embed_dim, embed_dim)),
        "out_proj_bias": jnp.zeros((embed_dim,), jnp.float32),
    }


# ----------------------------------------------------------------------------
# Pure-JAX reference (mirrors the PyTorch module) for a sanity check
# ----------------------------------------------------------------------------
def reference(params, query, key, value, attn_mask=None):
    E = params["embed_dim"]
    H = params["num_heads"]
    Hd = E // H
    T, B, _ = query.shape
    S = key.shape[0]
    w_in = params["in_proj_weight"]
    b_in = params["in_proj_bias"]

    q = query.reshape(T * B, E) @ w_in[:E].T + b_in[:E]
    k = key.reshape(S * B, E) @ w_in[E:2 * E].T + b_in[E:2 * E]
    v = value.reshape(S * B, E) @ w_in[2 * E:].T + b_in[2 * E:]

    q = (q * (Hd ** -0.5)).reshape(T, B * H, Hd).transpose(1, 0, 2)
    k = k.reshape(S, B * H, Hd).transpose(1, 0, 2)
    v = v.reshape(S, B * H, Hd).transpose(1, 0, 2)

    s = jnp.einsum("btd,bsd->bts", q, k)
    if attn_mask is not None:
        s = s + attn_mask[None]
    p = jax.nn.softmax(s, axis=-1)
    a = jnp.einsum("bts,bsd->btd", p, v)
    a = a.transpose(1, 0, 2).reshape(T, B, E)
    out = a.reshape(T * B, E) @ params["out_proj_weight"].T + params["out_proj_bias"]
    w_avg = p.reshape(B, H, T, S).sum(1) / H
    return out.reshape(T, B, E), w_avg


if __name__ == "__main__":
    T, B, E, H = 8, 2, 32, 4

    key = jax.random.PRNGKey(0)
    pkey, xkey = jax.random.split(key)
    params = init_params(pkey, E, H)

    x = jax.random.normal(xkey, (T, B, E), jnp.float32)  # self-attention input

    # --- no-mask path ---
    attn, attn_weights = multihead_attention_forward(params, x, x, x)
    attn = jax.block_until_ready(attn)
    attn_weights = jax.block_until_ready(attn_weights)

    ref_attn, ref_w = reference(params, x, x, x)
    assert attn.shape == (T, B, E)
    assert attn_weights.shape == (B, T, T)
    # tolerance accounts for approximate (EUP) reciprocal in the softmax
    assert jnp.allclose(attn, ref_attn, atol=2e-2, rtol=2e-2)
    assert jnp.allclose(attn_weights, ref_w, atol=5e-3, rtol=5e-3)

    # --- causal additive-mask path ---
    causal = jnp.where(jnp.tril(jnp.ones((T, T), dtype=bool)), 0.0, -1e9)
    causal = causal.astype(jnp.float32)
    attn_m, attn_weights_m = multihead_attention_forward(params, x, x, x,
                                                         attn_mask=causal)
    attn_m = jax.block_until_ready(attn_m)
    attn_weights_m = jax.block_until_ready(attn_weights_m)

    ref_attn_m, ref_w_m = reference(params, x, x, x, attn_mask=causal)
    assert jnp.allclose(attn_m, ref_attn_m, atol=2e-2, rtol=2e-2)
    assert jnp.allclose(attn_weights_m, ref_w_m, atol=5e-3, rtol=5e-3)

    print("KERNEL_OK")
</pallas_src>

<mosaic_0001>
module attributes {stable_mosaic.version = 11 : i64} {
  func.func @_linear_kernel(%arg0: i32, %arg1: i32, %arg2: i32, %arg3: memref<16x32xf32, #tpu.memory_space<vmem>>, %arg4: memref<96x32xf32, #tpu.memory_space<vmem>>, %arg5: memref<1x96xf32, #tpu.memory_space<vmem>>, %arg6: memref<16x96xf32, #tpu.memory_space<vmem>>, %arg7: memref<16x96xf32, #tpu.memory_space<vmem>>) attributes {dimension_semantics = [#tpu.dimension_semantics<parallel>, #tpu.dimension_semantics<parallel>, #tpu.dimension_semantics<arbitrary>], iteration_bounds = array<i64: 1, 1, 1>, scalar_prefetch = 0 : i64, scratch_operands = 1 : i64, tpu.core_type = #tpu.core_type<tc>, window_params = [{transform_indices = @transform_0, window_bounds = array<i64: 16, 32>}, {transform_indices = @transform_1, window_bounds = array<i64: 96, 32>}, {transform_indices = @transform_2, window_bounds = array<i64: 1, 96>}, {transform_indices = @transform_3, window_bounds = array<i64: 16, 96>}]} {
    %c0_i32 = arith.constant 0 : i32
    %0 = arith.cmpi eq, %arg2, %c0_i32 : i32
    %1 = arith.extui %0 : i1 to i32
    %c0_i32_0 = arith.constant 0 : i32
    %2 = arith.cmpi ne, %1, %c0_i32_0 : i32
    scf.if %2 {
      %cst_10 = arith.constant 0.000000e+00 : f32
      %12 = vector.broadcast %cst_10 : f32 to vector<16x96xf32>
      %c0_11 = arith.constant 0 : index
      %c0_12 = arith.constant 0 : index
      %13 = vector.load %arg7[%c0_11, %c0_12] : memref<16x96xf32, #tpu.memory_space<vmem>>, vector<16x96xf32>
      tpu.vector_store %arg7[%c0_11, %c0_12], %12 {strides = array<i32>} : memref<16x96xf32, #tpu.memory_space<vmem>>, vector<16x96xf32>,
    } else {
    }
    %c0 = arith.constant 0 : index
    %c0_1 = arith.constant 0 : index
    %3 = vector.load %arg7[%c0, %c0_1] : memref<16x96xf32, #tpu.memory_space<vmem>>, vector<16x96xf32>
    %c0_2 = arith.constant 0 : index
    %c0_3 = arith.constant 0 : index
    %4 = vector.load %arg3[%c0_2, %c0_3] : memref<16x32xf32, #tpu.memory_space<vmem>>, vector<16x32xf32>
    %c0_4 = arith.constant 0 : index
    %c0_5 = arith.constant 0 : index
    %5 = vector.load %arg4[%c0_4, %c0_5] : memref<96x32xf32, #tpu.memory_space<vmem>>, vector<96x32xf32>
    %cst = arith.constant dense<0.000000e+00> : vector<16x96xf32>
    %6 = tpu.matmul %4, %5, %cst {dimension_numbers = #tpu.dot_dimension_numbers<[1], [1], [0], [0], [0, 0, 1, 0], [], []>} : vector<16x32xf32>, vector<96x32xf32>, vector<16x96xf32> -> vector<16x96xf32>
    %7 = arith.addf %3, %6 : vector<16x96xf32>
    %c0_6 = arith.constant 0 : index
    %c0_7 = arith.constant 0 : index
    %8 = vector.load %arg7[%c0_6, %c0_7] : memref<16x96xf32, #tpu.memory_space<vmem>>, vector<16x96xf32>
    tpu.vector_store %arg7[%c0_6, %c0_7], %7 {strides = array<i32>} : memref<16x96xf32, #tpu.memory_space<vmem>>, vector<16x96xf32>,
    %c0_i32_8 = arith.constant 0 : i32
    %9 = arith.cmpi eq, %arg2, %c0_i32_8 : i32
    %10 = arith.extui %9 : i1 to i32
    %c0_i32_9 = arith.constant 0 : i32
    %11 = arith.cmpi ne, %10, %c0_i32_9 : i32
    scf.if %11 {
      %c0_10 = arith.constant 0 : index
      %c0_11 = arith.constant 0 : index
      %12 = vector.load %arg7[%c0_10, %c0_11] : memref<16x96xf32, #tpu.memory_space<vmem>>, vector<16x96xf32>
      %c0_12 = arith.constant 0 : index
      %c0_13 = arith.constant 0 : index
      %13 = vector.load %arg5[%c0_12, %c0_13] : memref<1x96xf32, #tpu.memory_space<vmem>>, vector<1x96xf32>
      %14 = vector.broadcast %13 : vector<1x96xf32> to vector<16x96xf32>
      %15 = arith.addf %12, %14 : vector<16x96xf32>
      %c0_14 = arith.constant 0 : index
      %c0_15 = arith.constant 0 : index
      %16 = vector.load %arg6[%c0_14, %c0_15] : memref<16x96xf32, #tpu.memory_space<vmem>>, vector<16x96xf32>
      tpu.vector_store %arg6[%c0_14, %c0_15], %15 {strides = array<i32>} : memref<16x96xf32, #tpu.memory_space<vmem>>, vector<16x96xf32>,
    } else {
    }
    return
  }
  func.func @transform_0(%arg0: i32, %arg1: i32, %arg2: i32) -> (i32, i32) {
    %c0_i32 = arith.constant 0 : i32
    return %arg0, %arg2 : i32, i32
  }
  func.func @transform_1(%arg0: i32, %arg1: i32, %arg2: i32) -> (i32, i32) {
    %c0_i32 = arith.constant 0 : i32
    return %arg1, %arg2 : i32, i32
  }
  func.func @transform_2(%arg0: i32, %arg1: i32, %arg2: i32) -> (i32, i32) {
    %c0_i32 = arith.constant 0 : i32
    %c0_i32_0 = arith.constant 0 : i32
    return %c0_i32, %arg1 : i32, i32
  }
  func.func @transform_3(%arg0: i32, %arg1: i32, %arg2: i32) -> (i32, i32) {
    %c0_i32 = arith.constant 0 : i32
    return %arg0, %arg1 : i32, i32
  }
}

</mosaic_0001>

<bundles_post_ra>
// kernel: tpu_custom_call.1
= control target key start
LH: loop header
LB: loop body
LE: loop exit
PB: predicated region body
PF: predicated region fallthrough
CT: control target
= control target key end

     0   :  { %vm38_vm0 = vcmask 261120   ;;  %s301_s0 = inlined_call_operand.vmem [shape: f32[16,32], index: 0, kind: input, shape index: {}]   ;;  %s302_s1 = inlined_call_operand.vmem [shape: f32[96,32], index: 1, kind: input, shape index: {}]   ;;  %s303_s2 = inlined_call_operand.vmem [shape: f32[1,96], index: 2, kind: input, shape index: {}]   ;;  %s304_s3 = inlined_call_operand.hbm [shape: f32[16,96], index: 3, kind: output, shape index: {}]  }
   0x1   :  { %v37_v0 = vld [vmem:[%s302_s1 + $0x58] sm:$0xff]  ;;  %v36_v1 = vld [vmem:[%s302_s1 + $0x50] sm:$0xff] }
   0x2   :  { %140 = vmatpush.xpose.msk.msra.mxu0 %vm38_vm0, %v37_v0  ;;  %154 = vmatpush.xpose.msk.msra.mxu1 %vm38_vm0, %v37_v0 }
   0x3   :  { %8 = vsyncpa [#allocation4], 0  ;;  %v35_v2 = vld [vmem:[%s302_s1 + $0x48] sm:$0xff]  ;;  %v34_v3 = vld [vmem:[%s302_s1 + $0x40] sm:$0xff]  ;;  %vm19_vm1 = vcmask 785408   ;;  %v197_v5 = vmov 0.0  }
   0x4   :  { %v33_v4 = vld [vmem:[%s302_s1 + $0x38] sm:$0xff]  ;;  %20 = vst.msk [vmem:[#allocation2] sm:$0xff] %vm19_vm1, %v197_v5  ;;  %v32_v6 = vld [vmem:[%s302_s1 + $0x30] sm:$0xff]  ;;  %v31_v7 = vld [vmem:[%s302_s1 + $0x28] sm:$0xff]  ;;  %s198_s14 = smov [#allocation3]   ;;  %s128_s17 = sshll.u32 %s304_s3, 4  ;;  %s129_s17 = int_to_ptr.hbm [resolvable:$true] %s128_s17 }
   0x5   :  { %21 = vst.msk [vmem:[#allocation2 + $0x8] sm:$0xff] %vm19_vm1, %v197_v5  ;;  %v30_v8 = vld [vmem:[%s302_s1 + $0x20] sm:$0xff]  ;;  %v29_v9 = vld [vmem:[%s302_s1 + $0x18] sm:$0xff]  ;;  %v28_v10 = vld [vmem:[%s302_s1 + $0x10] sm:$0xff]  ;;  %s199_s18 = smov 128   ;;  %s200_s19 = smov 8  }
   0x6   :  { %141 = vmatpush.xpose.msk.msra.mxu0 %vm38_vm0, %v36_v1  ;;  %155 = vmatpush.xpose.msk.msra.mxu1 %vm38_vm0, %v36_v1  ;;  %v27_v11 = vld [vmem:[%s302_s1 + $0x8] sm:$0xff]  ;;  %v26_v12 = vld [vmem:[%s302_s1] sm:$0xff] }
   0x7   :  { %v24_v13 = vld [vmem:[%s301_s0] sm:$0xff]  ;;  %v25_v14 = vld [vmem:[%s301_s0 + $0x8] sm:$0xff]  ;;  %s126_s0 = sshll.u32 %s198_s14, 4  ;;  %s127_s0 = int_to_ptr.vmem [resolvable:$true] %s126_s0 }
   0x8   :  { %v170_v21 = vld [vmem:[%s303_s2] ss:$0 sm:$0xff] }
   0xa   :  { %142 = vmatpush.xpose.msk.msra.mxu0 %vm38_vm0, %v35_v2  ;;  %156 = vmatpush.xpose.msk.msra.mxu1 %vm38_vm0, %v35_v2 }
   0xb   :  { %v22_v15 = vld [vmem:[#allocation2] sm:$0xff] }
   0xc   :  { %v23_v16 = vld [vmem:[#allocation2 + $0x8] sm:$0xff] }
   0xe   :  { %143 = vmatpush.xpose.msk.msra.mxu0 %vm38_vm0, %v34_v3  ;;  %157 = vmatpush.xpose.msk.msra.mxu1 %vm38_vm0, %v34_v3 }
  0x12   :  { %144 = vmatpush.xpose.msk.msra.mxu0 %vm38_vm0, %v33_v4  ;;  %158 = vmatpush.xpose.msk.msra.mxu1 %vm38_vm0, %v33_v4 }
  0x16   :  { %145 = vmatpush.xpose.msk.msra.mxu0 %vm38_vm0, %v32_v6  ;;  %159 = vmatpush.xpose.msk.msra.mxu1 %vm38_vm0, %v32_v6 }
  0x1a   :  { %146 = vmatpush.xpose.msk.msra.mxu0 %vm38_vm0, %v31_v7  ;;  %160 = vmatpush.xpose.msk.msra.mxu1 %vm38_vm0, %v31_v7 }
  0x1e   :  { %147 = vmatpush.xpose.msk.msra.mxu0 %vm38_vm0, %v30_v8  ;;  %161 = vmatpush.xpose.msk.msra.mxu1 %vm38_vm0, %v30_v8 }
  0x22   :  { %148 = vmatpush.xpose.msk.msra.mxu0 %vm38_vm0, %v29_v9  ;;  %162 = vmatpush.xpose.msk.msra.mxu1 %vm38_vm0, %v29_v9 }
  0x26   :  { %149 = vmatpush.xpose.msk.msra.mxu0 %vm38_vm0, %v28_v10  ;;  %163 = vmatpush.xpose.msk.msra.mxu1 %vm38_vm0, %v28_v10 }
  0x2a   :  { %150 = vmatpush.xpose.msk.msra.mxu0 %vm38_vm0, %v27_v11  ;;  %164 = vmatpush.xpose.msk.msra.mxu1 %vm38_vm0, %v27_v11 }
  0x2e   :  { %151 = vmatpush.xpose.msk.msra.mxu0 %vm38_vm0, %v26_v12  ;;  %165 = vmatpush.xpose.msk.msra.mxu1 %vm38_vm0, %v26_v12 }
  0x31   :  { %152 = vmatmul.msk.f32.vlgmr.msra.gmra.mxu0 %vm38_vm0, %v24_v13  ;;  %153 = vmatmul.msk.f32.vlgmr.msra.gmra.mxu1 %vm38_vm0, %v25_v14 }
  0xae   :  { %v98_v17 = vpop.f32.mrf.mxu0  ;;  %v101_v18 = vpop.f32.mrf.mxu1 }
  0xaf   :  { %v104_v19 = vadd.f32 %v98_v17, %v22_v15  ;;  %v105_v20 = vadd.f32 %v101_v18, %v23_v16 }
  0xb1   :  { %107 = vst.msk [vmem:[#allocation2] sm:$0xff] %vm19_vm1, %v104_v19 }
  0xb2   :  { %108 = vst.msk [vmem:[#allocation2 + $0x8] sm:$0xff] %vm19_vm1, %v105_v20 }
  0xb8   :  { %v112_v22 = vld [vmem:[#allocation2] sm:$0xff] }
  0xb9   :  { %v113_v23 = vld [vmem:[#allocation2 + $0x8] sm:$0xff]  ;;  %v118_v24 = vadd.f32 %v170_v21, %v112_v22 }
  0xba   :  { %v119_v25 = vadd.f32 %v170_v21, %v113_v23 }
  0xbb   :  { %120 = vst.msk [vmem:[#allocation3] sm:$0xff] %vm19_vm1, %v118_v24 }
  0xbc   :  { %121 = vst.msk [vmem:[#allocation3 + $0x8] sm:$0xff] %vm19_vm1, %v119_v25 }
  0xbd   :  { %134 = dma.vmem_to_hbm [thread:$0]  %s127_s0, 256, %s129_s17, [#allocation4], %s199_s18, %s199_s18, %s200_s19  }
  0xbe   :  { %195 = dma.done.wait [#allocation4], 256  }
  0xbf   :  { %196 = vsyncadd [#allocation4], 4294967040 }
  0xc0   :  { %139 = vsyncpa [#allocation4], 1 }

</bundles_post_ra>
